<compile_context>
chip_gen: v6e
topology: v6e:2x2x1
jax: 0.10.0
libtpu: 0.0.40
codegen_flags: <defaults>
</compile_context>

<pallas_src>
import functools

import jax
import jax.numpy as jnp
from jax.experimental import pallas as pl
from jax.experimental.pallas import tpu as pltpu


def _round_up(v, m):
    return ((v + m - 1) // m) * m


def _lanes(c):
    return _round_up(max(int(c), 1), 128)


def _sublane_multiple(dtype):
    # f32 -> 8, bf16 -> 16, int8/fp8 -> 32 (second-to-last block dim multiple).
    return max(8, 32 // jnp.dtype(dtype).itemsize)


def _num_tensorcores():
    # Megacore / multi-TensorCore chips benefit from a 2-way per-core partial
    # split; on single-TC chips (v5e/v6e) the split is just serial overhead.
    try:
        kind = jax.devices()[0].device_kind.lower()
    except Exception:
        return 1
    if any(tag in kind for tag in ("v4", "v5p", "v7", "7x")):
        return 2
    return 1


def _choose_tile_m(mp, kc, k, itemsize, sub,
                   target_bytes=2 << 20, vmem_cap_bytes=12 << 20):
    # Start from a real-HBM-bytes target per x tile (amortizes ~0.35us/step).
    t = max(sub, target_bytes // max(1, kc * itemsize))
    # Cap by the lane-padded, double-buffered VMEM footprint (+ elementwise
    # temporaries slack) so the scoped-VMEM budget holds on every chip.
    per_row = (2 * (_lanes(kc) * itemsize + _lanes(k) * 4)   # x + pc, 2 buffers
               + 3 * _lanes(kc) * 4)                         # mask/where temps
    t = min(t, max(sub, vmem_cap_bytes // per_row))
    # Never larger than the (rounded-up) number of packed rows: small inputs
    # collapse to one block -> a single (1, 1) grid step.
    t = min(t, _round_up(mp, sub))
    return max(sub, (int(t) // sub) * sub)


def _vmem_limit_bytes(tile_m, kc, k, itemsize):
    x_tile = tile_m * _lanes(kc) * itemsize
    pc_tile = tile_m * _lanes(k) * 4
    out_tile = 8 * 128 * 4
    acc = 8 * _lanes(kc) * 4
    temps = 3 * tile_m * _lanes(kc) * 4
    need = 2 * (x_tile + pc_tile + out_tile) + acc + temps + (1 << 20)
    return int(min(max(need, 4 << 20), 48 << 20))


def _nll_kernel(x_ref, pc_ref, o_ref, acc_ref, *, k, scale):
    # x_ref:  (tile_m, k*C) packed log-probs (any float dtype)
    # pc_ref: (tile_m, k)   int32 packed target columns (s*C + target)
    # o_ref:  (8, 128)      f32 per-part partial block
    # acc_ref:(8, k*C)      f32 running accumulator (VMEM scratch)
    i = pl.program_id(1)                      # reduction ("arbitrary") axis

    @pl.when(i == 0)
    def _init():
        acc_ref[...] = jnp.zeros_like(acc_ref)

    x = x_ref[...].astype(jnp.float32)        # cast after load (bf16-friendly)
    pc = pc_ref[...]                          # (tile_m, k) int32
    tm, kc = x.shape

    # Gather mask: one lane compare per packed sub-row, ORed (k is small).
    col = jax.lax.broadcasted_iota(jnp.int32, (tm, kc), 1)
    mask = col == pc[:, 0:1]
    for s in range(1, k):
        mask = mask | (col == pc[:, s:s + 1])

    picked = jnp.where(mask, x, 0.0)
    # Sublane-grouped partial sum: pure vreg-wise VALU adds in the streaming
    # loop; no cross-lane reduce until finalize.
    acc_ref[...] += picked.reshape(tm // 8, 8, kc).sum(axis=0)

    @pl.when(i == pl.num_programs(1) - 1)
    def _finalize():
        total = jnp.sum(acc_ref[...], keepdims=True)       # (1, 1), one reduce
        o_ref[...] = jnp.broadcast_to(total * scale, o_ref.shape)


def neg_ll_loss(x, target, min_problem=True, tile_m=None, num_parts=None):
    """Pallas TPU implementation of NegLLLoss.forward(x, target).

    x:      (N, C) float log-probabilities (f32 or bf16, streamed as-is)
    target: (N,)   integer class indices in [0, C)
    """
    n, c = x.shape
    itemsize = jnp.dtype(x.dtype).itemsize
    sub = _sublane_multiple(x.dtype)

    sign = 1.0 if min_problem else -1.0
    scale = -sign / float(n)                  # folded sign * mean constant

    # Lane packing: k original rows of width C share one 128-lane packed row.
    k = max(1, 128 // c) if c <= 64 else 1
    kc = k * c
    mp = pl.cdiv(n, k)                        # packed rows of real data

    if tile_m is None:
        tile_m = _choose_tile_m(mp, kc, k, itemsize, sub)
    tile_m = max(sub, (int(tile_m) // sub) * sub)

    num_tiles = pl.cdiv(mp, tile_m)
    if num_parts is None:
        num_parts = _num_tensorcores()
    num_parts = int(max(1, min(num_parts, num_tiles)))
    tiles_per_part = pl.cdiv(num_tiles, num_parts)

    # Pad to an exact grid: every tile is unique (no clamped duplicates) and
    # padded rows are zeros, so they contribute exactly nothing to the sum.
    m_total = num_parts * tiles_per_part * tile_m
    n_total = m_total * k
    x_pad = jnp.pad(x, ((0, n_total - n), (0, 0)))
    xp = x_pad.reshape(m_total, kc)
    t_pad = jnp.pad(target.astype(jnp.int32), (0, n_total - n))
    pc = t_pad.reshape(m_total, k) + (jnp.arange(k, dtype=jnp.int32) * c)[None, :]

    def in_map(p, i):
        return (p * tiles_per_part + i, 0)

    kernel = functools.partial(_nll_kernel, k=k, scale=scale)

    out = pl.pallas_call(
        kernel,
        out_shape=jax.ShapeDtypeStruct((num_parts * 8, 128), jnp.float32),
        grid_spec=pltpu.PrefetchScalarGridSpec(
            num_scalar_prefetch=0,
            grid=(num_parts, tiles_per_part),
            in_specs=[
                pl.BlockSpec((tile_m, kc), in_map),
                pl.BlockSpec((tile_m, k), in_map),
            ],
            out_specs=pl.BlockSpec((8, 128), lambda p, i: (p, 0)),
            scratch_shapes=[pltpu.VMEM((8, kc), jnp.float32)],
        ),
        compiler_params=pltpu.CompilerParams(
            dimension_semantics=("parallel", "arbitrary"),
            vmem_limit_bytes=_vmem_limit_bytes(tile_m, kc, k, itemsize),
        ),
        cost_estimate=pl.CostEstimate(
            flops=(k + 3) * m_total * kc,
            transcendentals=0,
            bytes_accessed=m_total * (kc * itemsize + k * 4)
            + num_parts * 8 * 128 * 4,
        ),
    )(xp, pc)

    # Each per-part partial already carries the folded -sign/N scale.
    return jnp.sum(out[::8, 0])


if __name__ == "__main__":
    key = jax.random.PRNGKey(0)
    k1, k2 = jax.random.split(key)

    batch, num_classes = 300, 10              # MNIST-scale shapes
    logits = jax.random.normal(k1, (batch, num_classes), dtype=jnp.float32)
    x = jax.nn.log_softmax(logits, axis=-1)   # NLLLoss expects log-probs
    target = jax.random.randint(k2, (batch,), 0, num_classes, dtype=jnp.int32)

    ref = -jnp.mean(x[jnp.arange(batch), target])

    # Default path: auto tile -> whole packed array in one block, (1, 1) grid.
    loss_min = neg_ll_loss(x, target, min_problem=True)
    loss_max = neg_ll_loss(x, target, min_problem=False)
    jax.block_until_ready((loss_min, loss_max))
    assert jnp.allclose(loss_min, ref, atol=1e-5), (loss_min, ref)
    assert jnp.allclose(loss_max, -ref, atol=1e-5), (loss_max, -ref)

    # Tiny tile + forced 2-way split: exercises the multi-tile streamed grid,
    # the parallel partial-sum axis, and the zero-padded tail tiles.
    loss_tiled = neg_ll_loss(x, target, min_problem=True, tile_m=8, num_parts=2)
    jax.block_until_ready(loss_tiled)
    assert jnp.allclose(loss_tiled, ref, atol=1e-5), (loss_tiled, ref)

    # bf16 log-probs stream straight through the kernel (16-row sublane tiles).
    loss_bf16 = neg_ll_loss(x.astype(jnp.bfloat16), target, min_problem=True)
    jax.block_until_ready(loss_bf16)
    assert jnp.allclose(loss_bf16, ref, atol=5e-2), (loss_bf16, ref)

    print("KERNEL_OK")
</pallas_src>

<mosaic_0001>
module attributes {stable_mosaic.version = 11 : i64} {
  func.func @_nll_kernel(%arg0: i32, %arg1: i32, %arg2: memref<32x120xf32, #tpu.memory_space<vmem>>, %arg3: memref<32x12xi32, #tpu.memory_space<vmem>>, %arg4: memref<8x128xf32, #tpu.memory_space<vmem>>, %arg5: memref<8x120xf32, #tpu.memory_space<vmem>>) attributes {dimension_semantics = [#tpu.dimension_semantics<parallel>, #tpu.dimension_semantics<arbitrary>], iteration_bounds = array<i64: 1, 1>, scalar_prefetch = 0 : i64, scratch_operands = 1 : i64, tpu.core_type = #tpu.core_type<tc>, window_params = [{transform_indices = @transform_0, window_bounds = array<i64: 32, 120>}, {transform_indices = @transform_1, window_bounds = array<i64: 32, 12>}, {transform_indices = @transform_2, window_bounds = array<i64: 8, 128>}]} {
    %c0_i32 = arith.constant 0 : i32
    %0 = arith.cmpi eq, %arg1, %c0_i32 : i32
    %1 = arith.extui %0 : i1 to i32
    %c0_i32_0 = arith.constant 0 : i32
    %2 = arith.cmpi ne, %1, %c0_i32_0 : i32
    scf.if %2 {
      %cst_11 = arith.constant 0.000000e+00 : f32
      %63 = vector.broadcast %cst_11 : f32 to vector<8x120xf32>
      %c0_12 = arith.constant 0 : index
      %c0_13 = arith.constant 0 : index
      %64 = vector.load %arg5[%c0_12, %c0_13] : memref<8x120xf32, #tpu.memory_space<vmem>>, vector<8x120xf32>
      tpu.vector_store %arg5[%c0_12, %c0_13], %63 {strides = array<i32>} : memref<8x120xf32, #tpu.memory_space<vmem>>, vector<8x120xf32>,
    } else {
    }
    %c0 = arith.constant 0 : index
    %c0_1 = arith.constant 0 : index
    %3 = vector.load %arg2[%c0, %c0_1] : memref<32x120xf32, #tpu.memory_space<vmem>>, vector<32x120xf32>
    %c0_2 = arith.constant 0 : index
    %c0_3 = arith.constant 0 : index
    %4 = vector.load %arg3[%c0_2, %c0_3] : memref<32x12xi32, #tpu.memory_space<vmem>>, vector<32x12xi32>
    %5 = tpu.iota {dimensions = array<i32: 1>} : vector<32x120xi32>
    %6 = vector.extract_strided_slice %4 {offsets = [0, 0], sizes = [32, 1], strides = [1, 1]} : vector<32x12xi32> to vector<32x1xi32>
    %7 = vector.broadcast %6 : vector<32x1xi32> to vector<32x120xi32>
    %8 = arith.cmpi eq, %5, %7 : vector<32x120xi32>
    %9 = vector.extract_strided_slice %4 {offsets = [0, 1], sizes = [32, 1], strides = [1, 1]} : vector<32x12xi32> to vector<32x1xi32>
    %10 = vector.broadcast %9 : vector<32x1xi32> to vector<32x120xi32>
    %11 = arith.cmpi eq, %5, %10 : vector<32x120xi32>
    %12 = arith.ori %8, %11 : vector<32x120xi1>
    %13 = vector.extract_strided_slice %4 {offsets = [0, 2], sizes = [32, 1], strides = [1, 1]} : vector<32x12xi32> to vector<32x1xi32>
    %14 = vector.broadcast %13 : vector<32x1xi32> to vector<32x120xi32>
    %15 = arith.cmpi eq, %5, %14 : vector<32x120xi32>
    %16 = arith.ori %12, %15 : vector<32x120xi1>
    %17 = vector.extract_strided_slice %4 {offsets = [0, 3], sizes = [32, 1], strides = [1, 1]} : vector<32x12xi32> to vector<32x1xi32>
    %18 = vector.broadcast %17 : vector<32x1xi32> to vector<32x120xi32>
    %19 = arith.cmpi eq, %5, %18 : vector<32x120xi32>
    %20 = arith.ori %16, %19 : vector<32x120xi1>
    %21 = vector.extract_strided_slice %4 {offsets = [0, 4], sizes = [32, 1], strides = [1, 1]} : vector<32x12xi32> to vector<32x1xi32>
    %22 = vector.broadcast %21 : vector<32x1xi32> to vector<32x120xi32>
    %23 = arith.cmpi eq, %5, %22 : vector<32x120xi32>
    %24 = arith.ori %20, %23 : vector<32x120xi1>
    %25 = vector.extract_strided_slice %4 {offsets = [0, 5], sizes = [32, 1], strides = [1, 1]} : vector<32x12xi32> to vector<32x1xi32>
    %26 = vector.broadcast %25 : vector<32x1xi32> to vector<32x120xi32>
    %27 = arith.cmpi eq, %5, %26 : vector<32x120xi32>
    %28 = arith.ori %24, %27 : vector<32x120xi1>
    %29 = vector.extract_strided_slice %4 {offsets = [0, 6], sizes = [32, 1], strides = [1, 1]} : vector<32x12xi32> to vector<32x1xi32>
    %30 = vector.broadcast %29 : vector<32x1xi32> to vector<32x120xi32>
    %31 = arith.cmpi eq, %5, %30 : vector<32x120xi32>
    %32 = arith.ori %28, %31 : vector<32x120xi1>
    %33 = vector.extract_strided_slice %4 {offsets = [0, 7], sizes = [32, 1], strides = [1, 1]} : vector<32x12xi32> to vector<32x1xi32>
    %34 = vector.broadcast %33 : vector<32x1xi32> to vector<32x120xi32>
    %35 = arith.cmpi eq, %5, %34 : vector<32x120xi32>
    %36 = arith.ori %32, %35 : vector<32x120xi1>
    %37 = vector.extract_strided_slice %4 {offsets = [0, 8], sizes = [32, 1], strides = [1, 1]} : vector<32x12xi32> to vector<32x1xi32>
    %38 = vector.broadcast %37 : vector<32x1xi32> to vector<32x120xi32>
    %39 = arith.cmpi eq, %5, %38 : vector<32x120xi32>
    %40 = arith.ori %36, %39 : vector<32x120xi1>
    %41 = vector.extract_strided_slice %4 {offsets = [0, 9], sizes = [32, 1], strides = [1, 1]} : vector<32x12xi32> to vector<32x1xi32>
    %42 = vector.broadcast %41 : vector<32x1xi32> to vector<32x120xi32>
    %43 = arith.cmpi eq, %5, %42 : vector<32x120xi32>
    %44 = arith.ori %40, %43 : vector<32x120xi1>
    %45 = vector.extract_strided_slice %4 {offsets = [0, 10], sizes = [32, 1], strides = [1, 1]} : vector<32x12xi32> to vector<32x1xi32>
    %46 = vector.broadcast %45 : vector<32x1xi32> to vector<32x120xi32>
    %47 = arith.cmpi eq, %5, %46 : vector<32x120xi32>
    %48 = arith.ori %44, %47 : vector<32x120xi1>
    %49 = vector.extract_strided_slice %4 {offsets = [0, 11], sizes = [32, 1], strides = [1, 1]} : vector<32x12xi32> to vector<32x1xi32>
    %50 = vector.broadcast %49 : vector<32x1xi32> to vector<32x120xi32>
    %51 = arith.cmpi eq, %5, %50 : vector<32x120xi32>
    %52 = arith.ori %48, %51 : vector<32x120xi1>
    %cst = arith.constant 0.000000e+00 : f32
    %53 = vector.broadcast %cst : f32 to vector<32x120xf32>
    %54 = arith.select %52, %3, %53 : vector<32x120xi1>, vector<32x120xf32>
    %c0_4 = arith.constant 0 : index
    %c0_5 = arith.constant 0 : index
    %55 = vector.load %arg5[%c0_4, %c0_5] : memref<8x120xf32, #tpu.memory_space<vmem>>, vector<8x120xf32>
    %56 = vector.shape_cast %54 : vector<32x120xf32> to vector<4x8x120xf32>
    %cst_6 = arith.constant dense<0.000000e+00> : vector<8x120xf32>
    %57 = vector.multi_reduction <add>, %56, %cst_6 [0] : vector<4x8x120xf32> to vector<8x120xf32>
    %58 = arith.addf %55, %57 : vector<8x120xf32>
    %c0_7 = arith.constant 0 : index
    %c0_8 = arith.constant 0 : index
    %59 = vector.load %arg5[%c0_7, %c0_8] : memref<8x120xf32, #tpu.memory_space<vmem>>, vector<8x120xf32>
    tpu.vector_store %arg5[%c0_7, %c0_8], %58 {strides = array<i32>} : memref<8x120xf32, #tpu.memory_space<vmem>>, vector<8x120xf32>,
    %c0_i32_9 = arith.constant 0 : i32
    %60 = arith.cmpi eq, %arg1, %c0_i32_9 : i32
    %61 = arith.extui %60 : i1 to i32
    %c0_i32_10 = arith.constant 0 : i32
    %62 = arith.cmpi ne, %61, %c0_i32_10 : i32
    scf.if %62 {
      %c0_11 = arith.constant 0 : index
      %c0_12 = arith.constant 0 : index
      %63 = vector.load %arg5[%c0_11, %c0_12] : memref<8x120xf32, #tpu.memory_space<vmem>>, vector<8x120xf32>
      %64 = vector.shape_cast %63 : vector<8x120xf32> to vector<1x8x120xf32>
      %cst_13 = arith.constant dense<0.000000e+00> : vector<1xf32>
      %65 = vector.multi_reduction <add>, %64, %cst_13 [1, 2] : vector<1x8x120xf32> to vector<1xf32>
      %66 = vector.shape_cast %65 : vector<1xf32> to vector<1x1x1xf32>
      %67 = vector.extract %66[0, 0, 0] : f32 from vector<1x1x1xf32>
      %68 = vector.broadcast %67 : f32 to vector<1x1xf32>
      %cst_14 = arith.constant -0.00333333341 : f32
      %69 = vector.broadcast %cst_14 : f32 to vector<1x1xf32>
      %70 = arith.mulf %68, %69 : vector<1x1xf32>
      %71 = vector.shape_cast %70 : vector<1x1xf32> to vector<1x1xf32>
      %72 = vector.broadcast %71 : vector<1x1xf32> to vector<8x128xf32>
      %c0_15 = arith.constant 0 : index
      %c0_16 = arith.constant 0 : index
      %73 = vector.load %arg4[%c0_15, %c0_16] : memref<8x128xf32, #tpu.memory_space<vmem>>, vector<8x128xf32>
      tpu.vector_store %arg4[%c0_15, %c0_16], %72 {strides = array<i32>} : memref<8x128xf32, #tpu.memory_space<vmem>>, vector<8x128xf32>,
    } else {
    }
    return
  }
  func.func @transform_0(%arg0: i32, %arg1: i32) -> (i32, i32) {
    %c1_i32 = arith.constant 1 : i32
    %0 = arith.muli %arg0, %c1_i32 : i32
    %1 = arith.addi %0, %arg1 : i32
    %c0_i32 = arith.constant 0 : i32
    %c0_i32_0 = arith.constant 0 : i32
    return %1, %c0_i32 : i32, i32
  }
  func.func @transform_1(%arg0: i32, %arg1: i32) -> (i32, i32) {
    %c1_i32 = arith.constant 1 : i32
    %0 = arith.muli %arg0, %c1_i32 : i32
    %1 = arith.addi %0, %arg1 : i32
    %c0_i32 = arith.constant 0 : i32
    %c0_i32_0 = arith.constant 0 : i32
    return %1, %c0_i32 : i32, i32
  }
  func.func @transform_2(%arg0: i32, %arg1: i32) -> (i32, i32) {
    %c0_i32 = arith.constant 0 : i32
    %c0_i32_0 = arith.constant 0 : i32
    return %arg0, %c0_i32 : i32, i32
  }
}

</mosaic_0001>

<bundles_post_ra>
// kernel: tpu_custom_call.1
= control target key start
LH: loop header
LB: loop body
LE: loop exit
PB: predicated region body
PF: predicated region fallthrough
CT: control target
= control target key end

     0   :  { %v441_v2 = vmov 1   ;;  %s649_s0 = inlined_call_operand.vmem [shape: f32[32,120], index: 0, kind: input, shape index: {}]   ;;  %s650_s1 = inlined_call_operand.vmem [shape: s32[32,12], index: 1, kind: input, shape index: {}]   ;;  %s651_s2 = inlined_call_operand.hbm [shape: f32[8,128], index: 2, kind: output, shape index: {}]  }
   0x1   :  { %v473_v0 = vld [vmem:[%s650_s1 + $0x10] sm:$0xff]  ;;  %v478_v1 = vld [vmem:[%s650_s1] sm:$0xff]  ;;  %385 = vset.pattern.permute.xlu0 %v441_v2  ;;  %382 = vset.pattern.permute.xlu1 %v441_v2 }
   0x2   :  { %95 = vperm.xlu0 %385, %v473_v0   ;;  %89 = vperm.xlu1 %382, %v478_v1  }
   0x3   :  { %7 = vsyncpa [#allocation4], 0  ;;  %v485_v3 = vld [vmem:[%s650_s1 + $0x8] sm:$0xff]  ;;  %v442_v4 = vmov 2   ;;  %v443_v5 = vmov 0   ;;  %v444_v6 = vmov 3   ;;  %v70_v20 = vlaneseq }
   0x4   :  { %v498_v7 = vld [vmem:[%s650_s1 + $0x18] sm:$0xff]  ;;  %v445_v8 = vmov 5   ;;  %v446_v9 = vmov 4   ;;  %v447_v10 = vmov 8   ;;  %v448_v11 = vmov 7  }
   0x5   :  { %v449_v12 = vmov 6   ;;  %v450_v13 = vmov 11   ;;  %v451_v14 = vmov 10   ;;  %v452_v15 = vmov 9  }
   0x6   :  { %386 = vset.pattern.permute.xlu0 %v442_v4  ;;  %92 = vperm.xlu1 %382, %v485_v3   ;;  %v535_v23 = vand.u32 127, %v70_v20  ;;  %vm652_vm4 = vcmask 982016   ;;  %v453_v26 = vmov 0.0   ;;  %v655_v35 = vmov 0 }
   0x7   :  { %109 = vperm.xlu0 %386, %v478_v1   ;;  %61 = vst.msk [vmem:[#allocation2] sm:$0xff] %vm652_vm4, %v453_v26  ;;  %v659_v40 = vmov 0 }
   0xa   :  { %383 = vset.pattern.permute.xlu1 %v442_v4 }
   0xb   :  { %115 = vperm.xlu0 %386, %v473_v0   ;;  %112 = vperm.xlu1 %383, %v485_v3  }
   0xf   :  { %388 = vset.pattern.permute.xlu0 %v443_v5  ;;  %384 = vset.pattern.permute.xlu1 %v443_v5 }
  0x10   :  { %73 = vperm.xlu0 %388, %v478_v1   ;;  %79 = vperm.xlu1 %384, %v473_v0  }
  0x14   :  { %76 = vperm.xlu0 %388, %v485_v3   ;;  %387 = vset.pattern.permute.xlu1 %v444_v6 }
  0x15   :  { %129 = vperm.xlu1 %387, %v478_v1  }
  0x18   :  { %82 = vperm.xlu0 %388, %v498_v7  }
  0x19   :  { %132 = vperm.xlu1 %387, %v485_v3  }
  0x1c   :  { %392 = vset.pattern.permute.xlu0 %v445_v8 }
  0x1d   :  { %389 = vset.pattern.permute.xlu1 %v446_v9  ;;  %169 = vperm.xlu0 %392, %v478_v1  }
  0x1e   :  { %149 = vperm.xlu1 %389, %v478_v1  }
  0x21   :  { %395 = vset.pattern.permute.xlu0 %v446_v9 }
  0x22   :  { %152 = vperm.xlu1 %389, %v485_v3   ;;  %155 = vperm.xlu0 %395, %v473_v0  }
  0x26   :  { %390 = vset.pattern.permute.xlu1 %v441_v2  ;;  %397 = vset.pattern.permute.xlu0 %v444_v6 }
  0x27   :  { %98 = vperm.xlu1 %390, %v498_v7   ;;  %138 = vperm.xlu0 %397, %v498_v7  }
  0x2b   :  { %391 = vset.pattern.permute.xlu1 %v444_v6  ;;  %402 = vset.pattern.permute.xlu0 %v447_v10 }
  0x2c   :  { %135 = vperm.xlu1 %391, %v473_v0   ;;  %229 = vperm.xlu0 %402, %v478_v1  }
  0x30   :  { %393 = vset.pattern.permute.xlu1 %v445_v8  ;;  %403 = vset.pattern.permute.xlu0 %v448_v11 }
  0x31   :  { %172 = vperm.xlu1 %393, %v485_v3   ;;  %212 = vperm.xlu0 %403, %v485_v3  }
  0x35   :  { %394 = vset.pattern.permute.xlu1 %v442_v4  ;;  %215 = vperm.xlu0 %403, %v473_v0  }
  0x36   :  { %118 = vperm.xlu1 %394, %v498_v7  }
  0x39   :  { %407 = vset.pattern.permute.xlu0 %v449_v12 }
  0x3a   :  { %396 = vset.pattern.permute.xlu1 %v449_v12  ;;  %198 = vperm.xlu0 %407, %v498_v7  }
  0x3b   :  { %189 = vperm.xlu1 %396, %v478_v1  }
  0x3e   :  { %412 = vset.pattern.permute.xlu0 %v450_v13 }
  0x3f   :  { %192 = vperm.xlu1 %396, %v485_v3   ;;  %289 = vperm.xlu0 %412, %v478_v1  }
  0x43   :  { %398 = vset.pattern.permute.xlu1 %v445_v8  ;;  %413 = vset.pattern.permute.xlu0 %v451_v14 }
  0x44   :  { %175 = vperm.xlu1 %398, %v473_v0   ;;  %272 = vperm.xlu0 %413, %v485_v3  }
  0x48   :  { %399 = vset.pattern.permute.xlu1 %v448_v11  ;;  %275 = vperm.xlu0 %413, %v473_v0  }
  0x49   :  { %209 = vperm.xlu1 %399, %v478_v1  }
  0x4c   :  { %278 = vperm.xlu0 %413, %v498_v7  }
  0x4d   :  { %400 = vset.pattern.permute.xlu1 %v446_v9 }
  0x4e   :  { %158 = vperm.xlu1 %400, %v498_v7  }
  0x50   :  { %418 = vset.pattern.permute.xlu0 %v450_v13 }
  0x52   :  { %401 = vset.pattern.permute.xlu1 %v449_v12 }
  0x53   :  { %195 = vperm.xlu1 %401, %v473_v0  }
  0x57   :  { %404 = vset.pattern.permute.xlu1 %v447_v10 }
  0x58   :  { %232 = vperm.xlu1 %404, %v485_v3  }
  0x5c   :  { %405 = vset.pattern.permute.xlu1 %v445_v8 }
  0x5d   :  { %178 = vperm.xlu1 %405, %v498_v7  }
  0x61   :  { %406 = vset.pattern.permute.xlu1 %v452_v15 }
  0x62   :  { %249 = vperm.xlu1 %406, %v478_v1  }
  0x66   :  { %252 = vperm.xlu1 %406, %v485_v3  }
  0x6a   :  { %408 = vset.pattern.permute.xlu1 %v447_v10 }
  0x6b   :  { %235 = vperm.xlu1 %408, %v473_v0  }
  0x6f   :  { %409 = vset.pattern.permute.xlu1 %v451_v14  ;;  %v64_v14 = vld [vmem:[%s649_s0 + $0x10] sm:$0xff] }
  0x70   :  { %269 = vperm.xlu1 %409, %v478_v1  }
  0x74   :  { %410 = vset.pattern.permute.xlu1 %v448_v11 }
  0x75   :  { %218 = vperm.xlu1 %410, %v498_v7  }
  0x79   :  { %411 = vset.pattern.permute.xlu1 %v452_v15 }
  0x7a   :  { %255 = vperm.xlu1 %411, %v473_v0  }
  0x7d   :  { %v90_v16 = vpop.permute.xlu1 %89  ;;  %v96_v17 = vpop.permute.xlu0 %95 }
  0x7e   :  { %414 = vset.pattern.permute.xlu1 %v450_v13  ;;  %vm100_vm0 = vcmp.eq.s32.totalorder %v535_v23, %v90_v16 }
  0x7f   :  { %292 = vperm.xlu1 %414, %v485_v3   ;;  %v63_v3 = vld [vmem:[%s649_s0 + $0x8] sm:$0xff] }
  0x81   :  { %v93_v18 = vpop.permute.xlu1 %92 }
  0x82   :  { %v110_v19 = vpop.permute.xlu0 %109  ;;  %vm101_vm5 = vcmp.eq.s32.totalorder %v535_v23, %v93_v18  ;;  %v65_v18 = vld [vmem:[%s649_s0 + $0x18] sm:$0xff] }
  0x83   :  { %415 = vset.pattern.permute.xlu1 %v447_v10  ;;  %vm120_vm2 = vcmp.eq.s32.totalorder %v535_v23, %v110_v19 }
  0x84   :  { %238 = vperm.xlu1 %415, %v498_v7  }
  0x86   :  { %v113_v21 = vpop.permute.xlu1 %112  ;;  %v116_v22 = vpop.permute.xlu0 %115 }
  0x87   :  { %vm121_vm10 = vcmp.eq.s32.totalorder %v535_v23, %v113_v21  ;;  %v312_v21 = vld [vmem:[#allocation2] sm:$0xff] }
  0x88   :  { %416 = vset.pattern.permute.xlu1 %v452_v15 }
  0x89   :  { %258 = vperm.xlu1 %416, %v498_v7  }
  0x8b   :  { %v74_v24 = vpop.permute.xlu0 %73  ;;  %v80_v25 = vpop.permute.xlu1 %79 }
  0x8c   :  { %vm84_vm1 = vcmp.eq.s32.totalorder %v535_v23, %v74_v24 }
  0x8d   :  { %vm104_vm3 = vmor %vm84_vm1, %vm100_vm0  ;;  %417 = vset.pattern.permute.xlu1 %v450_v13 }
  0x8e   :  { %295 = vperm.xlu1 %417, %v473_v0   ;;  %vm124_vm7 = vmor %vm104_vm3, %vm120_vm2  ;;  %vm102_vm3 = vcmp.eq.s32.totalorder %v535_v23, %v96_v17  ;;  %v62_v0 = vld [vmem:[%s649_s0] sm:$0xff]  ;;  %s454_s0 = smov [#allocation3]  }
  0x8f   :  { %v77_v27 = vpop.permute.xlu0 %76  ;;  %s346_s24 = sshll.u32 %s454_s0, 4  ;;  %s347_s24 = int_to_ptr.vmem [resolvable:$true] %s346_s24 }
  0x90   :  { %vm85_vm6 = vcmp.eq.s32.totalorder %v535_v23, %v77_v27  ;;  %v130_v28 = vpop.permute.xlu1 %129  ;;  %s419_s26 = scalar_lea.vmem %s347_s24, 128  ;;  %p424_p1 = scmp.lt.s32.totalorder %s347_s24, %s347_s24 }
  0x91   :  { %vm105_vm8 = vmor %vm85_vm6, %vm101_vm5  ;;  %vm140_vm9 = vcmp.eq.s32.totalorder %v535_v23, %v130_v28  ;;  %vm86_vm5 = vcmp.eq.s32.totalorder %v535_v23, %v80_v25  ;;  %vm122_vm6 = vcmp.eq.s32.totalorder %v535_v23, %v116_v22  ;;  %p420_p0 = scmp.ne.s32.totalorder %s347_s24, %s419_s26  ;;  %p425_p2 = scmp.lt.s32.totalorder %s419_s26, %s419_s26 }
  0x92   :  { %vm144_vm11 = vmor %vm124_vm7, %vm140_vm9  ;;  %298 = vperm.xlu1 %417, %v498_v7  }
  0x93   :  { %vm125_vm12 = vmor %vm105_vm8, %vm121_vm10  ;;  %v83_v37 = vpop.permute.xlu0 %82  ;;  %p426_p3 = por %p425_p2, %p424_p1 }
  0x94   :  { %v133_v29 = vpop.permute.xlu1 %132  ;;  %vm106_vm7 = vmor %vm86_vm5, %vm102_vm3 }
  0x95   :  { %vm141_vm13 = vcmp.eq.s32.totalorder %v535_v23, %v133_v29  ;;  %vm126_vm8 = vmor %vm106_vm7, %vm122_vm6  ;;  %p427_p4 = pnand %p426_p3, %p420_p0 }
  0x96   :  { %vm145_vm14 = vmor %vm125_vm12, %vm141_vm13  ;;  %vm87_vm13 = vcmp.eq.s32.totalorder %v535_v23, %v83_v37 }
  0x98   :  { %v170_v46 = vpop.permute.xlu0 %169 }
  0x99   :  { %v150_v30 = vpop.permute.xlu1 %149 }
  0x9a   :  { %vm160_vm15 = vcmp.eq.s32.totalorder %v535_v23, %v150_v30 }
  0x9b   :  { %vm550_vm0 = vmor %vm144_vm11, %vm160_vm15 }
  0x9d   :  { %v153_v32 = vpop.permute.xlu1 %152  ;;  %v156_v48 = vpop.permute.xlu0 %155 }
  0x9e   :  { %vm161_vm1 = vcmp.eq.s32.totalorder %v535_v23, %v153_v32 }
  0x9f   :  { %vm165_vm2 = vmor %vm145_vm14, %vm161_vm1 }
  0xa2   :  { %v99_v33 = vpop.permute.xlu1 %98  ;;  %v139_v50 = vpop.permute.xlu0 %138 }
  0xa3   :  { %vm103_vm14 = vcmp.eq.s32.totalorder %v535_v23, %v99_v33 }
  0xa4   :  { %vm107_vm15 = vmor %vm87_vm13, %vm103_vm14 }
  0xa7   :  { %v136_v34 = vpop.permute.xlu1 %135  ;;  %v230_v52 = vpop.permute.xlu0 %229 }
  0xa8   :  { %vm142_vm9 = vcmp.eq.s32.totalorder %v535_v23, %v136_v34  ;;  %vm240_vm14 = vcmp.eq.s32.totalorder %v535_v23, %v230_v52 }
  0xa9   :  { %vm559_vm10 = vmor %vm126_vm8, %vm142_vm9 }
  0xaa   :  { %v656_v35 = vsel %vm559_vm10, 4294967295, %v655_v35 }
  0xac   :  { %v173_v36 = vpop.permute.xlu1 %172  ;;  %v213_v54 = vpop.permute.xlu0 %212 }
  0xad   :  { %vm181_vm11 = vcmp.eq.s32.totalorder %v535_v23, %v173_v36  ;;  %vm221_vm13 = vcmp.eq.s32.totalorder %v535_v23, %v213_v54 }
  0xae   :  { %vm564_vm12 = vmor %vm165_vm2, %vm181_vm11  ;;  %vm180_vm2 = vcmp.eq.s32.totalorder %v535_v23, %v170_v46 }
  0xaf   :  { %vm184_vm7 = vmor %vm550_vm0, %vm180_vm2 }
  0xb0   :  { %v216_v56 = vpop.permute.xlu0 %215 }
  0xb1   :  { %v119_v39 = vpop.permute.xlu1 %118 }
  0xb2   :  { %vm123_vm1 = vcmp.eq.s32.totalorder %v535_v23, %v119_v39 }
  0xb3   :  { %vm571_vm3 = vmor %vm107_vm15, %vm123_vm1 }
  0xb4   :  { %v660_v40 = vsel %vm571_vm3, 4294967295, %v659_v40 }
  0xb5   :  { %v579_v58 = vpop.permute.xlu0 %198 }
  0xb6   :  { %v190_v41 = vpop.permute.xlu1 %189 }
  0xb7   :  { %vm200_vm5 = vcmp.eq.s32.totalorder %v535_v23, %v190_v41 }
  0xb8   :  { %vm204_vm9 = vmor %vm184_vm7, %vm200_vm5 }
  0xba   :  { %v193_v42 = vpop.permute.xlu1 %192  ;;  %v290_v60 = vpop.permute.xlu0 %289 }
  0xbb   :  { %vm201_vm6 = vcmp.eq.s32.totalorder %v535_v23, %v193_v42 }
  0xbc   :  { %vm205_vm11 = vmor %vm564_vm12, %vm201_vm6  ;;  %vm300_vm12 = vcmp.eq.s32.totalorder %v535_v23, %v290_v60 }
  0xbd   :  { %vm225_vm4 = vmor %vm205_vm11, %vm221_vm13  ;;  %vm162_vm13 = vcmp.eq.s32.totalorder %v535_v23, %v156_v48 }
  0xbf   :  { %v176_v43 = vpop.permute.xlu1 %175  ;;  %v273_v62 = vpop.permute.xlu0 %272 }
  0xc3   :  { %v276_v10 = vpop.permute.xlu0 %275 }
  0xc4   :  { %v210_v44 = vpop.permute.xlu1 %209 }
  0xc5   :  { %vm220_vm8 = vcmp.eq.s32.totalorder %v535_v23, %v210_v44 }
  0xc6   :  { %vm224_vm15 = vmor %vm204_vm9, %vm220_vm8  ;;  %vm281_vm9 = vcmp.eq.s32.totalorder %v535_v23, %v273_v62 }
  0xc7   :  { %vm244_vm2 = vmor %vm224_vm15, %vm240_vm14  ;;  %v279_v12 = vpop.permute.xlu0 %278 }
  0xc9   :  { %v575_v45 = vpop.permute.xlu1 %158 }
  0xce   :  { %v196_v47 = vpop.permute.xlu1 %195 }
  0xcf   :  { %vm202_vm14 = vcmp.eq.s32.totalorder %v535_v23, %v196_v47 }
  0xd3   :  { %v233_v49 = vpop.permute.xlu1 %232 }
  0xd4   :  { %vm241_vm0 = vcmp.eq.s32.totalorder %v535_v23, %v233_v49 }
  0xd5   :  { %vm245_vm7 = vmor %vm225_vm4, %vm241_vm0  ;;  %vm182_vm4 = vcmp.eq.s32.totalorder %v535_v23, %v176_v43 }
  0xd8   :  { %v577_v51 = vpop.permute.xlu1 %178 }
  0xdd   :  { %v250_v53 = vpop.permute.xlu1 %249 }
  0xde   :  { %vm260_vm1 = vcmp.eq.s32.totalorder %v535_v23, %v250_v53 }
  0xdf   :  { %vm264_vm10 = vmor %vm244_vm2, %vm260_vm1  ;;  %vm663_vm1 = vnez %v656_v35  ;;  %vm143_vm2 = vcmp.eq.s32.totalorder %v535_v23, %v139_v50 }
  0xe0   :  { %vm166_vm0 = vmor %vm663_vm1, %vm162_vm13  ;;  %vm183_vm13 = vcmp.eq.s32.totalorder %v535_v23, %v577_v51 }
  0xe1   :  { %v253_v55 = vpop.permute.xlu1 %252 }
  0xe2   :  { %vm261_vm5 = vcmp.eq.s32.totalorder %v535_v23, %v253_v55 }
  0xe3   :  { %vm265_vm8 = vmor %vm245_vm7, %vm261_vm5 }
  0xe4   :  { %vm186_vm5 = vmor %vm166_vm0, %vm182_vm4 }
  0xe6   :  { %v236_v57 = vpop.permute.xlu1 %235 }
  0xe7   :  { %vm242_vm4 = vcmp.eq.s32.totalorder %v535_v23, %v236_v57 }
  0xeb   :  { %v270_v59 = vpop.permute.xlu1 %269 }
  0xec   :  { %vm280_vm3 = vcmp.eq.s32.totalorder %v535_v23, %v270_v59 }
  0xed   :  { %vm284_vm6 = vmor %vm264_vm10, %vm280_vm3 }
  0xee   :  { %vm600_vm11 = vmor %vm284_vm6, %vm300_vm12  ;;  %vm163_vm12 = vcmp.eq.s32.totalorder %v535_v23, %v575_v45  ;;  %vm664_vm6 = vcmask 982016  }
  0xef   :  { %vm285_vm10 = vmor %vm265_vm8, %vm281_vm9  ;;  %v308_v4 = vsel %vm600_vm11, %v62_v0, 0.0  ;;  %vm222_vm9 = vcmp.eq.s32.totalorder %v535_v23, %v216_v56  ;;  %vm666_vm11 = vnez %v660_v40 }
  0xf0   :  { %v219_v61 = vpop.permute.xlu1 %218  ;;  %v314_v6 = vsel %vm664_vm6, %v308_v4, 0.0  ;;  %vm665_vm7 = vmmov %vm664_vm6 }
  0xf1   :  { %vm206_vm8 = vmor %vm186_vm5, %vm202_vm14  ;;  %vm203_vm14 = vcmp.eq.s32.totalorder %v535_v23, %v579_v58  ;;  %vm223_vm6 = vcmp.eq.s32.totalorder %v535_v23, %v219_v61 }
  0xf5   :  { %v256_v63 = vpop.permute.xlu1 %255 }
  0xf6   :  { %vm262_vm1 = vcmp.eq.s32.totalorder %v535_v23, %v256_v63 }
  0xfa   :  { %v293_v2 = vpop.permute.xlu1 %292 }
  0xfb   :  { %vm301_vm3 = vcmp.eq.s32.totalorder %v535_v23, %v293_v2 }
  0xfc   :  { %vm305_vm15 = vmor %vm285_vm10, %vm301_vm3 }
  0xfd   :  { %v309_v5 = vsel %vm305_vm15, %v63_v3, 0.0  ;;  %vm147_vm10 = vmor %vm666_vm11, %vm143_vm2  ;;  %vm282_vm2 = vcmp.eq.s32.totalorder %v535_v23, %v276_v10 }
  0xfe   :  { %v315_v7 = vsel %vm665_vm7, %v309_v5, 0.0  ;;  %vm167_vm3 = vmor %vm147_vm10, %vm163_vm12 }
  0xff   :  { %v316_v8 = vadd.f32 %v315_v7, %v314_v6  ;;  %v239_v9 = vpop.permute.xlu1 %238  ;;  %vm226_vm15 = vmor %vm206_vm8, %vm222_vm9 }
 0x100   :  { %vm187_vm0 = vmor %vm167_vm3, %vm183_vm13  ;;  %vm243_vm12 = vcmp.eq.s32.totalorder %v535_v23, %v239_v9 }
 0x101   :  { %vm246_vm5 = vmor %vm226_vm15, %vm242_vm4  ;;  %vm283_vm15 = vcmp.eq.s32.totalorder %v535_v23, %v279_v12 }
 0x102   :  { %vm266_vm7 = vmor %vm246_vm5, %vm262_vm1 }
 0x103   :  { %vm207_vm11 = vmor %vm187_vm0, %vm203_vm14  ;;  %vm667_vm0 = vcmask 982016  }
 0x104   :  { %v259_v11 = vpop.permute.xlu1 %258  ;;  %vm227_vm10 = vmor %vm207_vm11, %vm223_vm6 }
 0x105   :  { %vm263_vm8 = vcmp.eq.s32.totalorder %v535_v23, %v259_v11  ;;  %vm286_vm9 = vmor %vm266_vm7, %vm282_vm2 }
 0x106   :  { %vm247_vm3 = vmor %vm227_vm10, %vm243_vm12 }
 0x107   :  { %vm267_vm13 = vmor %vm247_vm3, %vm263_vm8 }
 0x108   :  { %vm287_vm14 = vmor %vm267_vm13, %vm283_vm15 }
 0x109   :  { %v296_v13 = vpop.permute.xlu1 %295  ;;  %vm668_vm7 = vmmov %vm667_vm0 }
 0x10a   :  { %vm302_vm4 = vcmp.eq.s32.totalorder %v535_v23, %v296_v13  ;;  %vm669_vm2 = vmmov %vm667_vm0 }
 0x10b   :  { %vm306_vm1 = vmor %vm286_vm9, %vm302_vm4 }
 0x10c   :  { %v310_v15 = vsel %vm306_vm1, %v64_v14, 0.0  ;;  %vm670_vm11 = vmmov %vm667_vm0 }
 0x10d   :  { %v317_v16 = vsel %vm667_vm0, %v310_v15, 0.0  ;;  %v299_v17 = vpop.permute.xlu1 %298 }
 0x10e   :  { %v318_v19 = vadd.f32 %v317_v16, %v316_v8  ;;  %vm303_vm5 = vcmp.eq.s32.totalorder %v535_v23, %v299_v17 }
 0x10f   :  { %vm307_vm6 = vmor %vm287_vm14, %vm303_vm5 }
 0x110   :  { %v311_v20 = vsel %vm307_vm6, %v65_v18, 0.0 }
 0x111   :  { %v319_v22 = vsel %vm668_vm7, %v311_v20, 0.0 }
 0x112   :  { %v320_v24 = vadd.f32 %v319_v22, %v318_v19 }
 0x114   :  { %v321_v25 = vadd.f32 %v320_v24, %v312_v21 }
 0x116   :  { %322 = vst.msk [vmem:[#allocation2] sm:$0xff] %vm669_vm2, %v321_v25 }
 0x11d   :  { %v326_v26 = vld [vmem:[#allocation2] sm:$0xff] }
 0x11e   :  { %v327_v27 = vsel %vm670_vm11, %v326_v26, 0.0 }
 0x11f   :  { %328 = vadd.xlane.f32.xlu0 %v327_v27 }
 0x1a8   :  { %v329_v28 = vpop.xlane.xlu0 %328 }
 0x1a9   :  { %v330_v29 = vrot.slane %v329_v28, 4 }
 0x1ab   :  { %v331_v30 = vadd.f32 %v330_v29, %v329_v28 }
 0x1ad   :  { %v332_v31 = vrot.slane %v331_v30, 2 }
 0x1af   :  { %v333_v32 = vadd.f32 %v332_v31, %v331_v30 }
 0x1b1   :  { %v334_v33 = vrot.slane %v333_v32, 1 }
 0x1b3   :  { %v335_v23 = vadd.f32 %v334_v33, %v333_v32 }
 0x1b5   :  { %366 = vpush %v335_v23 }
 0x1e6   :  { %s367_s25 = spop %366 }
 0x1e7   :  { %v337_v34 = vstv %s367_s25 }
 0x1e8   :  { %v338_v35 = vmul.f32 -0.0033333334, %v337_v34 }
 0x1ea   :  { %339 = vst [vmem:[#allocation3] sm:$0xff] %v338_v35 }
 0x1eb   :  { %430 = shalt.err (!%p427_p4)
}
 0x1ec   :  { %349 = dma.vmem_to_hbm [thread:$0]  %s347_s24, 128, %s651_s2, [#allocation4]  }
 0x1ed   :  { %439 = dma.done.wait [#allocation4], 128  }
 0x1ee   :  { %440 = vsyncadd [#allocation4], 4294967168 }
 0x1ef   :  { %353 = vsyncpa [#allocation4], 1 }

</bundles_post_ra>
